<compile_context>
chip_gen: v5e
topology: v5e:2x2
jax: 0.10.0
libtpu: 0.0.40
codegen_flags: <defaults>
</compile_context>

<pallas_src>
import jax
import jax.numpy as jnp
from jax.experimental import pallas as pl
from jax.experimental.pallas import tpu as pltpu


def _round_up(x, m):
    return ((x + m - 1) // m) * m


def _vmem_capacity_bytes():
    """Best-effort query of per-core VMEM capacity; conservative fallback."""
    try:
        info = pltpu.get_tpu_info()
        for attr in ("vmem_capacity_bytes", "vmem_size_bytes"):
            v = getattr(info, attr, None)
            if v:
                return int(v)
    except Exception:
        pass
    return 64 << 20  # conservative (v7x-sized) default if query unavailable


def _select_tiles():
    """Per-chip (tm, tn, tk, vmem_limit_bytes) defaults, sized from VMEM."""
    cap = _vmem_capacity_bytes()
    if cap >= (96 << 20):
        # v5e / v6e: 128 MiB VMEM.  Double-buffered usage at these tiles:
        # 2*(x 4 MiB + wT 8 MiB) + 2*(out 8 MiB) ~= 40 MiB.
        return 1024, 2048, 2048, 96 << 20
    # v7x: 64 MiB VMEM per TensorCore.  Usage ~= 2*(3 + 4) + 2*3 = 20 MiB.
    return 768, 1024, 2048, 44 << 20


def bf16_linear_kernel(x_ref, wt_ref, b_ref, o_ref):
    """One (tm, tn) output tile of y = fp32(bf16(bf16(x) @ W^T + b)).

    x_ref:  bf16 [tm, tk]   (activation, pre-cast in the wrapper)
    wt_ref: bf16 [tk, tn]   (W^T, pre-transposed once in the wrapper)
    b_ref:  bf16 [1,  tn]
    o_ref:  f32  [tm, tn]   resident across the k axis -> used as accumulator
    """
    k = pl.program_id(2)

    @pl.when(k == 0)
    def _():
        o_ref[...] = jnp.zeros_like(o_ref)

    # Native [M,K]x[K,N] bf16 MXU matmul with f32 accumulation, accumulated
    # directly into the resident f32 output block (no scratch, no extra copy).
    o_ref[...] += jnp.dot(x_ref[...], wt_ref[...],
                          preferred_element_type=jnp.float32)

    @pl.when(k == pl.num_programs(2) - 1)
    def _():
        # f32 bias add on the accumulator, then emulate the bf16 module output
        # rounding and the final bf16_to_fp32 cast of BF16_Module.forward.
        y = o_ref[...] + b_ref[...].astype(jnp.float32)
        o_ref[...] = y.astype(jnp.bfloat16).astype(jnp.float32)


def bf16_module_forward(x_fp32, w_bf16, b_bf16):
    """Equivalent of BF16_Module(nn.Linear(H, O)).forward(x_fp32) -> fp32."""
    B, S, H = x_fp32.shape
    O, H_w = w_bf16.shape
    assert H == H_w
    M = B * S

    # BF16_Module semantics: fp32_to_bf16 on the inputs, module runs in bf16.
    # One cheap XLA elementwise pass here instead of re-converting the same x
    # tile inside the kernel for every N stripe.
    x = x_fp32.reshape(M, H).astype(jnp.bfloat16)
    # Weight transposed once to [H, O]; amortized, and keeps the kernel's
    # contraction in native [M,K]x[K,N] form.
    wt = w_bf16.T
    b = b_bf16.reshape(1, O)

    tm_def, tn_def, tk_def, vmem_limit = _select_tiles()

    # Full-dim blocks for small dims (always legal), chip-sized tiles otherwise.
    tm = M if M <= tm_def else tm_def
    tn = O if O <= tn_def else tn_def
    tk = H if H <= tk_def else tk_def

    # Megacore occupancy (v7x has 2 TensorCores): keep >= 2 parallel (i, j)
    # tiles when the shape allows it, splitting N rather than M.
    if pl.cdiv(M, tm) * pl.cdiv(O, tn) < 2 and O > 128:
        tn = _round_up(pl.cdiv(O, 2), 128)

    # Only the contraction dim needs explicit zero-padding: unpadded boundary
    # K blocks would feed unspecified values into the accumulation.  M/N
    # boundaries are handled by the cdiv grid + masked boundary stores.
    Hp = _round_up(H, tk)
    if Hp != H:
        x = jnp.pad(x, ((0, 0), (0, Hp - H)))
        wt = jnp.pad(wt, ((0, Hp - H), (0, 0)))

    gm, gn, gk = pl.cdiv(M, tm), pl.cdiv(O, tn), Hp // tk
    grid = (gm, gn, gk)

    out = pl.pallas_call(
        bf16_linear_kernel,
        out_shape=jax.ShapeDtypeStruct((M, O), jnp.float32),
        grid_spec=pltpu.PrefetchScalarGridSpec(
            num_scalar_prefetch=0,
            grid=grid,
            in_specs=[
                pl.BlockSpec((tm, tk), lambda i, j, k: (i, k)),   # x  bf16 [M, Hp]
                pl.BlockSpec((tk, tn), lambda i, j, k: (k, j)),   # Wt bf16 [Hp, O]
                pl.BlockSpec((1, tn), lambda i, j, k: (0, j)),    # b  bf16 [1, O]
            ],
            out_specs=pl.BlockSpec((tm, tn), lambda i, j, k: (i, j)),
        ),
        compiler_params=pltpu.CompilerParams(
            dimension_semantics=("parallel", "parallel", "arbitrary"),
            vmem_limit_bytes=vmem_limit,
        ),
        cost_estimate=pl.CostEstimate(
            flops=2 * M * Hp * O,
            transcendentals=0,
            # Include tile re-fetch factors: x is re-read once per N stripe,
            # W^T once per M stripe; f32 output written once.
            bytes_accessed=int(gn * M * Hp * 2 + gm * Hp * O * 2
                               + M * O * 4 + gm * O * 2),
        ),
    )(x, wt, b)

    return out.reshape(B, S, O)


# TODO(synk): state_dict/load_state_dict and the recursive conversion_helper
# over nested tuple/list inputs are module plumbing with no kernel equivalent;
# only the forward compute path (cast -> bf16 linear -> cast) is implemented.


if __name__ == "__main__":
    # Small shapes: batch=2, seq=8, hidden=32, out_features=64
    B, S, H, O = 2, 8, 32, 64

    key = jax.random.PRNGKey(0)
    kx, kw, kb = jax.random.split(key, 3)

    # The module's __init__ holds a Linear(H, O) cast to bf16 by .bfloat16().
    x = jax.random.normal(kx, (B, S, H), dtype=jnp.float32)
    w = (jax.random.normal(kw, (O, H), dtype=jnp.float32) * 0.02).astype(jnp.bfloat16)
    b = (jax.random.normal(kb, (O,), dtype=jnp.float32) * 0.01).astype(jnp.bfloat16)

    fwd = jax.jit(bf16_module_forward)
    y = fwd(x, w, b)
    jax.block_until_ready(y)

    # Sanity: fp32 output dtype/shape as BF16_Module.forward returns.
    assert y.dtype == jnp.float32 and y.shape == (B, S, O)

    # Pure-JAX reference with matching bf16 semantics (bf16 matmul with f32
    # accumulation, f32 bias add, bf16 module output cast back to fp32).
    acc = jnp.dot(x.reshape(B * S, H).astype(jnp.bfloat16), w.T,
                  preferred_element_type=jnp.float32)
    ref = (acc + b.astype(jnp.float32)).astype(jnp.bfloat16).astype(jnp.float32)
    ref = ref.reshape(B, S, O)
    assert jnp.allclose(y, ref, atol=1e-2, rtol=1e-2)

    print("KERNEL_OK")
</pallas_src>

<mosaic_0001>
module attributes {stable_mosaic.version = 11 : i64} {
  func.func @bf16_linear_kernel(%arg0: i32, %arg1: i32, %arg2: i32, %arg3: memref<16x32xbf16, #tpu.memory_space<vmem>>, %arg4: memref<32x64xbf16, #tpu.memory_space<vmem>>, %arg5: memref<1x64xbf16, #tpu.memory_space<vmem>>, %arg6: memref<16x64xf32, #tpu.memory_space<vmem>>) attributes {dimension_semantics = [#tpu.dimension_semantics<parallel>, #tpu.dimension_semantics<parallel>, #tpu.dimension_semantics<arbitrary>], iteration_bounds = array<i64: 1, 1, 1>, scalar_prefetch = 0 : i64, scratch_operands = 0 : i64, tpu.core_type = #tpu.core_type<tc>, window_params = [{transform_indices = @transform_0, window_bounds = array<i64: 16, 32>}, {transform_indices = @transform_1, window_bounds = array<i64: 32, 64>}, {transform_indices = @transform_2, window_bounds = array<i64: 1, 64>}, {transform_indices = @transform_3, window_bounds = array<i64: 16, 64>}]} {
    %c0_i32 = arith.constant 0 : i32
    %0 = arith.cmpi eq, %arg2, %c0_i32 : i32
    %1 = arith.extui %0 : i1 to i32
    %c0_i32_0 = arith.constant 0 : i32
    %2 = arith.cmpi ne, %1, %c0_i32_0 : i32
    scf.if %2 {
      %cst_10 = arith.constant 0.000000e+00 : f32
      %12 = vector.broadcast %cst_10 : f32 to vector<16x64xf32>
      %c0_11 = arith.constant 0 : index
      %c0_12 = arith.constant 0 : index
      %13 = vector.load %arg6[%c0_11, %c0_12] : memref<16x64xf32, #tpu.memory_space<vmem>>, vector<16x64xf32>
      tpu.vector_store %arg6[%c0_11, %c0_12], %12 {strides = array<i32>} : memref<16x64xf32, #tpu.memory_space<vmem>>, vector<16x64xf32>,
    } else {
    }
    %c0 = arith.constant 0 : index
    %c0_1 = arith.constant 0 : index
    %3 = vector.load %arg6[%c0, %c0_1] : memref<16x64xf32, #tpu.memory_space<vmem>>, vector<16x64xf32>
    %c0_2 = arith.constant 0 : index
    %c0_3 = arith.constant 0 : index
    %4 = vector.load %arg3[%c0_2, %c0_3] : memref<16x32xbf16, #tpu.memory_space<vmem>>, vector<16x32xbf16>
    %c0_4 = arith.constant 0 : index
    %c0_5 = arith.constant 0 : index
    %5 = vector.load %arg4[%c0_4, %c0_5] : memref<32x64xbf16, #tpu.memory_space<vmem>>, vector<32x64xbf16>
    %cst = arith.constant dense<0.000000e+00> : vector<16x64xf32>
    %6 = tpu.matmul %4, %5, %cst {dimension_numbers = #tpu.dot_dimension_numbers<[1], [0], [0], [1], [0, 0, 1, 1], [], []>} : vector<16x32xbf16>, vector<32x64xbf16>, vector<16x64xf32> -> vector<16x64xf32>
    %7 = arith.addf %3, %6 : vector<16x64xf32>
    %c0_6 = arith.constant 0 : index
    %c0_7 = arith.constant 0 : index
    %8 = vector.load %arg6[%c0_6, %c0_7] : memref<16x64xf32, #tpu.memory_space<vmem>>, vector<16x64xf32>
    tpu.vector_store %arg6[%c0_6, %c0_7], %7 {strides = array<i32>} : memref<16x64xf32, #tpu.memory_space<vmem>>, vector<16x64xf32>,
    %c0_i32_8 = arith.constant 0 : i32
    %9 = arith.cmpi eq, %arg2, %c0_i32_8 : i32
    %10 = arith.extui %9 : i1 to i32
    %c0_i32_9 = arith.constant 0 : i32
    %11 = arith.cmpi ne, %10, %c0_i32_9 : i32
    scf.if %11 {
      %c0_10 = arith.constant 0 : index
      %c0_11 = arith.constant 0 : index
      %12 = vector.load %arg6[%c0_10, %c0_11] : memref<16x64xf32, #tpu.memory_space<vmem>>, vector<16x64xf32>
      %c0_12 = arith.constant 0 : index
      %c0_13 = arith.constant 0 : index
      %13 = vector.load %arg5[%c0_12, %c0_13] : memref<1x64xbf16, #tpu.memory_space<vmem>>, vector<1x64xbf16>
      %14 = arith.extf %13 : vector<1x64xbf16> to vector<1x64xf32>
      %15 = vector.broadcast %14 : vector<1x64xf32> to vector<16x64xf32>
      %16 = arith.addf %12, %15 : vector<16x64xf32>
      %17 = arith.truncf %16 : vector<16x64xf32> to vector<16x64xbf16>
      %18 = arith.extf %17 : vector<16x64xbf16> to vector<16x64xf32>
      %c0_14 = arith.constant 0 : index
      %c0_15 = arith.constant 0 : index
      %19 = vector.load %arg6[%c0_14, %c0_15] : memref<16x64xf32, #tpu.memory_space<vmem>>, vector<16x64xf32>
      tpu.vector_store %arg6[%c0_14, %c0_15], %18 {strides = array<i32>} : memref<16x64xf32, #tpu.memory_space<vmem>>, vector<16x64xf32>,
    } else {
    }
    return
  }
  func.func @transform_0(%arg0: i32, %arg1: i32, %arg2: i32) -> (i32, i32) {
    %c0_i32 = arith.constant 0 : i32
    return %arg0, %arg2 : i32, i32
  }
  func.func @transform_1(%arg0: i32, %arg1: i32, %arg2: i32) -> (i32, i32) {
    %c0_i32 = arith.constant 0 : i32
    return %arg2, %arg1 : i32, i32
  }
  func.func @transform_2(%arg0: i32, %arg1: i32, %arg2: i32) -> (i32, i32) {
    %c0_i32 = arith.constant 0 : i32
    %c0_i32_0 = arith.constant 0 : i32
    return %c0_i32, %arg1 : i32, i32
  }
  func.func @transform_3(%arg0: i32, %arg1: i32, %arg2: i32) -> (i32, i32) {
    %c0_i32 = arith.constant 0 : i32
    return %arg0, %arg1 : i32, i32
  }
}

</mosaic_0001>

<bundles_post_ra>
// kernel: bf16_module_forward.1
= control target key start
LH: loop header
LB: loop body
LE: loop exit
PB: predicated region body
PF: predicated region fallthrough
CT: control target
= control target key end

     0   :  { %vm20_vm0 = vcmask 523264   ;;  %v151_v1 = vmov 0.0   ;;  %s196_s0 = inlined_call_operand.vmem [shape: bf16[16,32], index: 0, kind: input, shape index: {}]   ;;  %s197_s1 = inlined_call_operand.vmem [shape: bf16[32,64], index: 1, kind: input, shape index: {}]   ;;  %s198_s2 = inlined_call_operand.vmem [shape: bf16[1,64], index: 2, kind: input, shape index: {}]   ;;  %s199_s3 = inlined_call_operand.hbm [shape: f32[16,64], index: 3, kind: output, shape index: {}]  }
   0x1   :  { %v120_v0 = vld [vmem:[%s197_s1 + $0x8] sm:$0xff]  ;;  %21 = vst.msk [vmem:[#allocation2] sm:$0xff] %vm20_vm0, %v151_v1 }
   0x2   :  { %8 = vsyncpa [#allocation3], 0  ;;  %58 = vmatpush.bf16.msra.mxu0 %v120_v0  ;;  %v119_v2 = vld [vmem:[%s197_s1] sm:$0xff]  ;;  %22 = vst.msk [vmem:[#allocation2 + $0x8] sm:$0xff] %vm20_vm0, %v151_v1  ;;  %vm48_vm1 = vcmask 261120   ;;  %s93_s21 = sshll.u32 %s199_s3, 4  ;;  %s94_s21 = int_to_ptr.hbm [resolvable:$true] %s93_s21 }
   0x3   :  { %v118_v3 = vld [vmem:[%s196_s0] sm:$0xff]  ;;  %s152_s0 = smov [#allocation2]   ;;  %s153_s22 = smov 128  }
   0x4   :  { %v76_v6 = vld [vmem:[%s198_s2] sm:$0x1]  ;;  %s91_s1 = sshll.u32 %s152_s0, 4  ;;  %s154_s23 = smov 8   ;;  %s92_s1 = int_to_ptr.vmem [resolvable:$true] %s91_s1 }
   0x5   :  { %v77_v8 = vunpack.c.l.bf16 %v76_v6 }
   0x6   :  { %59 = vmatpush.bf16.msra.mxu0 %v119_v2 }
   0x7   :  { %v78_v10 = vperm.slane %v77_v8, 0 }
   0x8   :  { %v23_v4 = vld [vmem:[#allocation2] sm:$0xff] }
   0x9   :  { %117 = vmatmul.msk.bf16.vlgmr.msra.gmra.mxu0 %vm48_vm1, %v118_v3  ;;  %v24_v9 = vld [vmem:[#allocation2 + $0x8] sm:$0xff] }
  0x86   :  { %v61_v5 = vpop.f32.mrf.mxu0 }
  0x87   :  { %v66_v7 = vadd.f32 %v61_v5, %v23_v4 }
  0x89   :  { %69 = vst.msk [vmem:[#allocation2] sm:$0xff] %vm20_vm0, %v66_v7 }
  0x8e   :  { %v63_v11 = vpop.f32.mrf.mxu0 }
  0x8f   :  { %v67_v12 = vadd.f32 %v63_v11, %v24_v9 }
  0x90   :  { %v74_v13 = vld [vmem:[#allocation2] sm:$0xff] }
  0x91   :  { %v79_v14 = vadd.f32 %v78_v10, %v74_v13  ;;  %70 = vst.msk [vmem:[#allocation2 + $0x8] sm:$0xff] %vm20_vm0, %v67_v12 }
  0x93   :  { %v81_v15 = vpack.c.bf16 %v79_v14, %v79_v14 }
  0x95   :  { %v83_v16 = vunpack.c.l.bf16 %v81_v15 }
  0x97   :  { %85 = vst.msk [vmem:[#allocation2] sm:$0xff] %vm20_vm0, %v83_v16 }
  0x98   :  { %v75_v17 = vld [vmem:[#allocation2 + $0x8] sm:$0xff] }
  0x99   :  { %v80_v18 = vadd.f32 %v78_v10, %v75_v17 }
  0x9b   :  { %v82_v19 = vpack.c.bf16 %v80_v18, %v80_v18 }
  0x9d   :  { %v84_v20 = vunpack.c.l.bf16 %v82_v19 }
  0x9f   :  { %86 = vst.msk [vmem:[#allocation2 + $0x8] sm:$0xff] %vm20_vm0, %v84_v20 }
  0xa0   :  { %99 = dma.vmem_to_hbm [thread:$0]  %s92_s1, 256, %s94_s21, [#allocation3], %s153_s22, %s153_s22, %s154_s23  }
  0xa1   :  { %149 = dma.done.wait [#allocation3], 256  }
  0xa2   :  { %150 = vsyncadd [#allocation3], 4294967040 }
  0xa3   :  { %104 = vsyncpa [#allocation3], 1 }

</bundles_post_ra>
